<compile_context>
chip_gen: v5e
topology: v5e:2x2
jax: 0.10.0
libtpu: 0.0.40
codegen_flags: <defaults>
</compile_context>

<pallas_src>
import functools

import jax
import jax.numpy as jnp
from jax.experimental import pallas as pl
from jax.experimental.pallas import tpu as pltpu

NEG_PAD = -1e30  # bias for padded class columns of the last layer (not -inf: avoids 0*inf NaN)


def mlp_forward_kernel(x_ref, y_ref, w_ref, b_ref, soft_ref, loss_ref, *, d_in):
    """x:(B,d_in) f32, y:(B,1) int32, w:(L,P,P) padded weights, b:(L,P) padded biases.

    Outputs: soft:(B,P) lane-dense softmax (padded classes are exactly 0),
             loss:(1,1) summed cross-entropy (SMEM scalar).
    """
    B, P = soft_ref.shape
    L = w_ref.shape[0]

    b_all = b_ref[...]                                 # (L, P): one load, static sublane slices

    # First layer: fold the input zero-padding into a static weight slice
    # (x @ W0[:d_in, :]  ==  zero_pad(x) @ W0, since padded rows of W0 are zero).
    h = jnp.maximum(
        jnp.dot(x_ref[...], w_ref[0, :d_in, :], preferred_element_type=jnp.float32)
        + b_all[0:1, :],
        0.0)

    # remaining hidden layers: Linear -> ReLU (zero padding keeps padded columns exactly 0)
    for l in range(1, L - 1):
        h = jnp.maximum(
            jnp.dot(h, w_ref[l], preferred_element_type=jnp.float32) + b_all[l:l + 1, :],
            0.0)

    # final Linear -> logits; padded class columns come out as ~NEG_PAD
    logits = jnp.dot(h, w_ref[L - 1], preferred_element_type=jnp.float32) + b_all[L - 1:L, :]

    # numerically stable softmax; padded columns give exp(NEG_PAD - m) == 0 exactly
    m = jnp.max(logits, axis=-1, keepdims=True)        # (B, 1)
    e = jnp.exp(logits - m)                            # (B, P)
    denom = jnp.sum(e, axis=-1, keepdims=True)         # (B, 1)
    soft_ref[...] = e / denom                          # exact f32 division (correctness fix)

    # CrossEntropyLoss(reduction='sum'):  sum_b [ logsumexp(logits_b) - logits_b[y_b] ]
    # Padded columns contribute 0 (exp == 0, onehot == 0; -1e30 * 0 == 0, no NaN).
    y = y_ref[...]                                     # (B, 1) int32 labels
    col = jax.lax.broadcasted_iota(jnp.int32, (B, P), 1)
    onehot = (col == y).astype(jnp.float32)            # (B, P)
    picked = jnp.sum(logits * onehot, axis=-1, keepdims=True)
    lse = m + jnp.log(denom)
    loss_ref[0, 0] = jnp.sum(lse - picked)


def pack_params(params):
    """One-time prep: pad every Linear to (P,P)/(P,) and stack -> 2 operands instead of 8.

    P is max(dims) rounded up to a multiple of 128 (full-lane vregs, unmasked stores).
    Hidden-layer padded weights/biases stay 0 (ReLU keeps padded activations at 0);
    the last layer's padded class columns get a NEG_PAD bias so those classes get
    exactly 0 softmax mass and never win the argmax.
    """
    dims = [params[0][0].shape[0]] + [w.shape[1] for w, _ in params]
    P = max(128, ((max(dims) + 127) // 128) * 128)
    L = len(params)
    out_dim = dims[-1]
    w_pack = jnp.zeros((L, P, P), jnp.float32)
    b_pack = jnp.zeros((L, P), jnp.float32).at[L - 1, out_dim:].set(NEG_PAD)
    for i, (w, b) in enumerate(params):
        w_pack = w_pack.at[i, :w.shape[0], :w.shape[1]].set(w.astype(jnp.float32))
        b_pack = b_pack.at[i, :b.shape[0]].set(b.astype(jnp.float32))
    return w_pack, b_pack, out_dim


@functools.partial(jax.jit, static_argnames=("out_dim",))
def network_forward(x, y, w_pack, b_pack, *, out_dim):
    """x: (B, D_in) float32, y: (B,) int labels. Returns (hard_pred, soft_pred, ce_loss)."""
    B, d_in = x.shape
    P = w_pack.shape[1]
    y2 = y.reshape(B, 1).astype(jnp.int32)

    vmem = pl.BlockSpec(memory_space=pltpu.MemorySpace.VMEM)
    smem = pl.BlockSpec(memory_space=pltpu.MemorySpace.SMEM)

    soft_full, loss = pl.pallas_call(
        functools.partial(mlp_forward_kernel, d_in=d_in),
        out_shape=(
            jax.ShapeDtypeStruct((B, P), jnp.float32),    # lane-dense softmax (padded to P)
            jax.ShapeDtypeStruct((1, 1), jnp.float32),    # summed CE loss (SMEM scalar)
        ),
        in_specs=[vmem, vmem, vmem, vmem],
        out_specs=(vmem, smem),
    )(x.astype(jnp.float32), y2, w_pack, b_pack)

    soft = soft_full[:, :out_dim]
    # torch.max(p, dim=-1)[1] on the softmax: argmax (first occurrence) in the wrapper,
    # avoiding a masked 1-lane store / extra output DMA inside the kernel.
    pred = jnp.argmax(soft, axis=-1).astype(jnp.int32)
    return pred, soft, loss[0, 0]


def init_params(key, input_dim, hidden_dims, output_dim):
    """Deterministic init matching nn.Linear shapes (stored transposed: [in, out])."""
    dims = [input_dim] + list(hidden_dims) + [output_dim]
    params = []
    for i in range(len(dims) - 1):
        key, kw, kb = jax.random.split(key, 3)
        bound = 1.0 / (dims[i] ** 0.5)
        w = jax.random.uniform(kw, (dims[i], dims[i + 1]), jnp.float32, -bound, bound)
        b = jax.random.uniform(kb, (dims[i + 1],), jnp.float32, -bound, bound)
        params.append((w, b))
    return params


def _reference(x, y, params):
    h = x
    for w, b in params[:-1]:
        h = jnp.maximum(h @ w + b, 0.0)
    w, b = params[-1]
    logits = h @ w + b
    soft = jax.nn.softmax(logits, axis=-1)
    pred = jnp.argmax(soft, axis=-1).astype(jnp.int32)
    lse = jax.nn.logsumexp(logits, axis=-1)
    picked = jnp.take_along_axis(logits, y[:, None], axis=-1)[:, 0]
    loss = jnp.sum(lse - picked)
    return pred, soft, loss


if __name__ == "__main__":
    # Small shapes consistent with the module: batch=8, input_dim=32,
    # hidden_dims=[64, 64, 64], output_dim=10.
    B, D_IN, HIDDEN, C = 8, 32, [64, 64, 64], 10

    key = jax.random.PRNGKey(0)
    kx, ky, kp = jax.random.split(key, 3)
    x = jax.random.normal(kx, (B, D_IN), jnp.float32)
    y = jax.random.randint(ky, (B,), 0, C, jnp.int32)
    params = init_params(kp, D_IN, HIDDEN, C)

    w_pack, b_pack, out_dim = pack_params(params)   # one-time packing (cacheable)
    pred, soft, loss = jax.block_until_ready(
        network_forward(x, y, w_pack, b_pack, out_dim=out_dim))

    # sanity check against pure-JAX reference (all-f32 path -> tight tolerances)
    pred_ref, soft_ref, loss_ref = _reference(x, y, params)
    assert pred.shape == (B,) and soft.shape == (B, C)
    assert jnp.all(pred == pred_ref)
    assert jnp.allclose(soft, soft_ref, atol=1e-5, rtol=1e-5)
    assert jnp.allclose(loss, loss_ref, atol=1e-3, rtol=1e-5)

    # TODO(synk): backward pass / Adam step() not translated (forward-only kernel).
    print("KERNEL_OK")
</pallas_src>

<mosaic_0001>
module attributes {stable_mosaic.version = 11 : i64} {
  func.func @mlp_forward_kernel(%arg0: memref<8x32xf32, #tpu.memory_space<vmem>>, %arg1: memref<8x1xi32, #tpu.memory_space<vmem>>, %arg2: memref<4x128x128xf32, #tpu.memory_space<vmem>>, %arg3: memref<4x128xf32, #tpu.memory_space<vmem>>, %arg4: memref<8x128xf32, #tpu.memory_space<vmem>>, %arg5: memref<1x1xf32, #tpu.memory_space<smem>>) attributes {dimension_semantics = [], scalar_prefetch = 0 : i64, scratch_operands = 0 : i64, tpu.core_type = #tpu.core_type<tc>} {
    %c0 = arith.constant 0 : index
    %c0_0 = arith.constant 0 : index
    %0 = vector.load %arg3[%c0, %c0_0] : memref<4x128xf32, #tpu.memory_space<vmem>>, vector<4x128xf32>
    %c0_1 = arith.constant 0 : index
    %c0_2 = arith.constant 0 : index
    %1 = vector.load %arg0[%c0_1, %c0_2] : memref<8x32xf32, #tpu.memory_space<vmem>>, vector<8x32xf32>
    %c0_3 = arith.constant 0 : index
    %c0_4 = arith.constant 0 : index
    %c0_5 = arith.constant 0 : index
    %2 = vector.load %arg2[%c0_3, %c0_4, %c0_5] : memref<4x128x128xf32, #tpu.memory_space<vmem>>, vector<1x32x128xf32>
    %3 = vector.shape_cast %2 : vector<1x32x128xf32> to vector<32x128xf32>
    %cst = arith.constant dense<0.000000e+00> : vector<8x128xf32>
    %4 = tpu.matmul %1, %3, %cst {dimension_numbers = #tpu.dot_dimension_numbers<[1], [0], [0], [1], [0, 0, 1, 1], [], []>} : vector<8x32xf32>, vector<32x128xf32>, vector<8x128xf32> -> vector<8x128xf32>
    %5 = vector.extract_strided_slice %0 {offsets = [0, 0], sizes = [1, 128], strides = [1, 1]} : vector<4x128xf32> to vector<1x128xf32>
    %6 = vector.broadcast %5 : vector<1x128xf32> to vector<8x128xf32>
    %7 = arith.addf %4, %6 : vector<8x128xf32>
    %cst_6 = arith.constant 0.000000e+00 : f32
    %8 = vector.broadcast %cst_6 : f32 to vector<8x128xf32>
    %9 = arith.maximumf %7, %8 : vector<8x128xf32>
    %c1 = arith.constant 1 : index
    %c0_7 = arith.constant 0 : index
    %c0_8 = arith.constant 0 : index
    %10 = vector.load %arg2[%c1, %c0_7, %c0_8] : memref<4x128x128xf32, #tpu.memory_space<vmem>>, vector<1x128x128xf32>
    %11 = vector.shape_cast %10 : vector<1x128x128xf32> to vector<128x128xf32>
    %cst_9 = arith.constant dense<0.000000e+00> : vector<8x128xf32>
    %12 = tpu.matmul %9, %11, %cst_9 {dimension_numbers = #tpu.dot_dimension_numbers<[1], [0], [0], [1], [0, 0, 1, 1], [], []>} : vector<8x128xf32>, vector<128x128xf32>, vector<8x128xf32> -> vector<8x128xf32>
    %13 = vector.extract_strided_slice %0 {offsets = [1, 0], sizes = [1, 128], strides = [1, 1]} : vector<4x128xf32> to vector<1x128xf32>
    %14 = vector.broadcast %13 : vector<1x128xf32> to vector<8x128xf32>
    %15 = arith.addf %12, %14 : vector<8x128xf32>
    %cst_10 = arith.constant 0.000000e+00 : f32
    %16 = vector.broadcast %cst_10 : f32 to vector<8x128xf32>
    %17 = arith.maximumf %15, %16 : vector<8x128xf32>
    %c2 = arith.constant 2 : index
    %c0_11 = arith.constant 0 : index
    %c0_12 = arith.constant 0 : index
    %18 = vector.load %arg2[%c2, %c0_11, %c0_12] : memref<4x128x128xf32, #tpu.memory_space<vmem>>, vector<1x128x128xf32>
    %19 = vector.shape_cast %18 : vector<1x128x128xf32> to vector<128x128xf32>
    %cst_13 = arith.constant dense<0.000000e+00> : vector<8x128xf32>
    %20 = tpu.matmul %17, %19, %cst_13 {dimension_numbers = #tpu.dot_dimension_numbers<[1], [0], [0], [1], [0, 0, 1, 1], [], []>} : vector<8x128xf32>, vector<128x128xf32>, vector<8x128xf32> -> vector<8x128xf32>
    %21 = vector.extract_strided_slice %0 {offsets = [2, 0], sizes = [1, 128], strides = [1, 1]} : vector<4x128xf32> to vector<1x128xf32>
    %22 = vector.broadcast %21 : vector<1x128xf32> to vector<8x128xf32>
    %23 = arith.addf %20, %22 : vector<8x128xf32>
    %cst_14 = arith.constant 0.000000e+00 : f32
    %24 = vector.broadcast %cst_14 : f32 to vector<8x128xf32>
    %25 = arith.maximumf %23, %24 : vector<8x128xf32>
    %c3 = arith.constant 3 : index
    %c0_15 = arith.constant 0 : index
    %c0_16 = arith.constant 0 : index
    %26 = vector.load %arg2[%c3, %c0_15, %c0_16] : memref<4x128x128xf32, #tpu.memory_space<vmem>>, vector<1x128x128xf32>
    %27 = vector.shape_cast %26 : vector<1x128x128xf32> to vector<128x128xf32>
    %cst_17 = arith.constant dense<0.000000e+00> : vector<8x128xf32>
    %28 = tpu.matmul %25, %27, %cst_17 {dimension_numbers = #tpu.dot_dimension_numbers<[1], [0], [0], [1], [0, 0, 1, 1], [], []>} : vector<8x128xf32>, vector<128x128xf32>, vector<8x128xf32> -> vector<8x128xf32>
    %29 = vector.extract_strided_slice %0 {offsets = [3, 0], sizes = [1, 128], strides = [1, 1]} : vector<4x128xf32> to vector<1x128xf32>
    %30 = vector.broadcast %29 : vector<1x128xf32> to vector<8x128xf32>
    %31 = arith.addf %28, %30 : vector<8x128xf32>
    %cst_18 = arith.constant dense<0xFF800000> : vector<8xf32>
    %32 = vector.multi_reduction <maximumf>, %31, %cst_18 [1] : vector<8x128xf32> to vector<8xf32>
    %33 = vector.shape_cast %32 : vector<8xf32> to vector<8x1xf32>
    %34 = vector.broadcast %33 : vector<8x1xf32> to vector<8x128xf32>
    %35 = arith.subf %31, %34 : vector<8x128xf32>
    %36 = math.exp %35 : vector<8x128xf32>
    %cst_19 = arith.constant dense<0.000000e+00> : vector<8xf32>
    %37 = vector.multi_reduction <add>, %36, %cst_19 [1] : vector<8x128xf32> to vector<8xf32>
    %38 = vector.shape_cast %37 : vector<8xf32> to vector<8x1xf32>
    %39 = vector.broadcast %38 : vector<8x1xf32> to vector<8x128xf32>
    %40 = arith.divf %36, %39 : vector<8x128xf32>
    %c0_20 = arith.constant 0 : index
    %c0_21 = arith.constant 0 : index
    %41 = vector.load %arg4[%c0_20, %c0_21] : memref<8x128xf32, #tpu.memory_space<vmem>>, vector<8x128xf32>
    tpu.vector_store %arg4[%c0_20, %c0_21], %40 {strides = array<i32>} : memref<8x128xf32, #tpu.memory_space<vmem>>, vector<8x128xf32>,
    %c0_22 = arith.constant 0 : index
    %c0_23 = arith.constant 0 : index
    %42 = vector.load %arg1[%c0_22, %c0_23] : memref<8x1xi32, #tpu.memory_space<vmem>>, vector<8x1xi32>
    %43 = tpu.iota {dimensions = array<i32: 1>} : vector<8x128xi32>
    %44 = vector.broadcast %42 : vector<8x1xi32> to vector<8x128xi32>
    %45 = arith.cmpi eq, %43, %44 : vector<8x128xi32>
    %46 = arith.extui %45 : vector<8x128xi1> to vector<8x128xi32>
    %47 = arith.sitofp %46 : vector<8x128xi32> to vector<8x128xf32>
    %48 = arith.mulf %31, %47 : vector<8x128xf32>
    %cst_24 = arith.constant dense<0.000000e+00> : vector<8xf32>
    %49 = vector.multi_reduction <add>, %48, %cst_24 [1] : vector<8x128xf32> to vector<8xf32>
    %50 = vector.shape_cast %49 : vector<8xf32> to vector<8x1xf32>
    %51 = math.log %38 : vector<8x1xf32>
    %52 = arith.addf %33, %51 : vector<8x1xf32>
    %53 = arith.subf %52, %50 : vector<8x1xf32>
    %54 = vector.shape_cast %53 : vector<8x1xf32> to vector<1x8x1xf32>
    %cst_25 = arith.constant dense<0.000000e+00> : vector<1xf32>
    %55 = vector.multi_reduction <add>, %54, %cst_25 [1, 2] : vector<1x8x1xf32> to vector<1xf32>
    %56 = vector.shape_cast %55 : vector<1xf32> to vector<1x1x1xf32>
    %57 = vector.extract %56[0, 0, 0] : f32 from vector<1x1x1xf32>
    %c0_26 = arith.constant 0 : index
    %c0_27 = arith.constant 0 : index
    %58 = memref.load %arg5[%c0_26, %c0_27] : memref<1x1xf32, #tpu.memory_space<smem>>
    memref.store %57, %arg5[%c0_26, %c0_27] : memref<1x1xf32, #tpu.memory_space<smem>>
    return
  }
}

</mosaic_0001>

<bundles_post_ra>
// kernel: network_forward.1
= control target key start
LH: loop header
LB: loop body
LE: loop exit
PB: predicated region body
PF: predicated region fallthrough
CT: control target
= control target key end

     0   :  { %11 = vsyncpa [#allocation3], 0  ;;  %s416_s0 = inlined_call_operand.vmem [shape: f32[8,32], index: 0, kind: input, shape index: {}]   ;;  %s417_s1 = inlined_call_operand.vmem [shape: s32[8,1], index: 1, kind: input, shape index: {}]   ;;  %s418_s2 = inlined_call_operand.hbm [shape: f32[4,128,128], index: 2, kind: input, shape index: {}]   ;;  %s419_s3 = inlined_call_operand.hbm [shape: f32[4,128], index: 3, kind: input, shape index: {}]   ;;  %s420_s4 = inlined_call_operand.vmem [shape: f32[8,128], index: 4, kind: output, shape index: {0}]   ;;  %s421_s5 = inlined_call_operand.hbm [shape: f32[1,1], index: 5, kind: output, shape index: {1}]  }
   0x1   :  { %12 = vsyncpa [#allocation6], 0 }
   0x2   :  { %13 = vsyncpa [#allocation4], 0  ;;  %s22_s20 = sshll.u32 %s418_s2, 4  ;;  %s355_s21 = smov [#allocation2]   ;;  %s23_s20 = int_to_ptr.hbm [resolvable:$true] %s22_s20 }
   0x3   :  { %s24_s22 = sshll.u32 %s355_s21, 4  ;;  %s36_s25 = sshll.u32 %s419_s3, 4  ;;  %s25_s22 = int_to_ptr.vmem [resolvable:$true] %s24_s22  ;;  %s37_s25 = int_to_ptr.hbm [resolvable:$true] %s36_s25 }
   0x4   :  { %s356_s26 = smov 128   ;;  %s357_s27 = smov 8  }
   0x5   :  { %30 = dma.hbm_to_vmem [thread:$0]  %s23_s20, 8192, %s25_s22, [#allocation3], %s356_s26, %s356_s26, %s357_s27  }
   0x6   :  { %s358_s28 = smov [#allocation5]  }
   0x7   :  { %s38_s29 = sshll.u32 %s358_s28, 4  ;;  %s39_s29 = int_to_ptr.vmem [resolvable:$true] %s38_s29 }
   0x8   :  { %41 = dma.hbm_to_vmem [thread:$0]  %s37_s25, 64, %s39_s29, [#allocation6]  }
   0x9   :  { %349 = dma.done.wait [#allocation3], 8192  }
   0xa   :  { %350 = vsyncadd [#allocation3], 4294959104 }
   0xb   :  { %351 = dma.done.wait [#allocation6], 64  }
   0xc   :  { %352 = vsyncadd [#allocation6], 4294967232  ;;  %v55_v0 = vld [vmem:[#allocation2 + $0x18] sm:$0xff]  ;;  %v54_v1 = vld [vmem:[#allocation2 + $0x10] sm:$0xff]  ;;  %vm57_vm0 = vcmask 261120   ;;  %vm237_vm3 = vcmask 7168  }
   0xd   :  { %73 = vmatpush.msra.mxu0 %v55_v0  ;;  %v98_v2 = vld [vmem:[#allocation2 + $0xf8] sm:$0xff]  ;;  %v53_v3 = vld [vmem:[#allocation2 + $0x8] sm:$0xff]  ;;  %v97_v4 = vld [vmem:[#allocation2 + $0xf0] sm:$0xff]  ;;  %s257_s9 = sshll.u32 %s421_s5, 4  ;;  %s361_s11 = smov [#allocation7]   ;;  %s258_s9 = int_to_ptr.hbm [resolvable:$true] %s257_s9 }
   0xe   :  { %100 = vmatpush.msra.mxu1 %v98_v2  ;;  %v96_v5 = vld [vmem:[#allocation2 + $0xe8] sm:$0xff]  ;;  %v52_v6 = vld [vmem:[#allocation2] sm:$0xff]  ;;  %v94_v9 = vld [vmem:[#allocation2 + $0xd8] sm:$0xff]  ;;  %v359_v2 = vmov 0  }
   0xf   :  { %74 = vmatpush.msra.mxu0 %v54_v1  ;;  %v51_v7 = vld [vmem:[%s416_s0] sm:$0xff]  ;;  %v93_v10 = vld [vmem:[#allocation2 + $0xd0] sm:$0xff]  ;;  %v92_v11 = vld [vmem:[#allocation2 + $0xc8] sm:$0xff]  ;;  %282 = vset.pattern.permute.xlu0 %v359_v2 }
  0x10   :  { %101 = vmatpush.msra.mxu1 %v97_v4  ;;  %v95_v8 = vld [vmem:[#allocation2 + $0xe0] sm:$0xff]  ;;  %v90_v13 = vld [vmem:[#allocation2 + $0xb8] sm:$0xff]  ;;  %v89_v14 = vld [vmem:[#allocation2 + $0xb0] sm:$0xff] }
  0x11   :  { %75 = vmatpush.msra.mxu0 %v53_v3  ;;  %v91_v12 = vld [vmem:[#allocation2 + $0xc0] sm:$0xff]  ;;  %v88_v15 = vld [vmem:[#allocation2 + $0xa8] sm:$0xff]  ;;  %v86_v17 = vld [vmem:[#allocation2 + $0x98] sm:$0xff] }
  0x12   :  { %102 = vmatpush.msra.mxu1 %v96_v5  ;;  %v87_v16 = vld [vmem:[#allocation2 + $0xa0] sm:$0xff]  ;;  %v85_v18 = vld [vmem:[#allocation2 + $0x90] sm:$0xff]  ;;  %v84_v19 = vld [vmem:[#allocation2 + $0x88] sm:$0xff] }
  0x13   :  { %76 = vmatpush.msra.mxu0 %v52_v6  ;;  %v83_v20 = vld [vmem:[#allocation2 + $0x80] sm:$0xff]  ;;  %v137_v21 = vld [vmem:[#allocation2 + $0x178] sm:$0xff]  ;;  %v136_v22 = vld [vmem:[#allocation2 + $0x170] sm:$0xff] }
  0x14   :  { %271 = vmatmul.msk.f32.vlgmr.msra.gmra.mxu0 %vm57_vm0, %v51_v7  ;;  %103 = vmatpush.msra.mxu1 %v95_v8  ;;  %v135_v23 = vld [vmem:[#allocation2 + $0x168] sm:$0xff]  ;;  %v134_v24 = vld [vmem:[#allocation2 + $0x160] sm:$0xff]  ;;  %v133_v25 = vld [vmem:[#allocation2 + $0x158] sm:$0xff] }
  0x15   :  { %139 = vmatpush.msra.mxu2 %v137_v21  ;;  %v132_v26 = vld [vmem:[#allocation2 + $0x150] sm:$0xff]  ;;  %v131_v27 = vld [vmem:[#allocation2 + $0x148] sm:$0xff]  ;;  %v130_v28 = vld [vmem:[#allocation2 + $0x140] sm:$0xff] }
  0x16   :  { %104 = vmatpush.msra.mxu1 %v94_v9  ;;  %v129_v29 = vld [vmem:[#allocation2 + $0x138] sm:$0xff]  ;;  %v128_v30 = vld [vmem:[#allocation2 + $0x130] sm:$0xff]  ;;  %v127_v31 = vld [vmem:[#allocation2 + $0x128] sm:$0xff] }
  0x17   :  { %140 = vmatpush.msra.mxu2 %v136_v22  ;;  %v126_v32 = vld [vmem:[#allocation2 + $0x120] sm:$0xff]  ;;  %v125_v34 = vld [vmem:[#allocation2 + $0x118] sm:$0xff]  ;;  %v124_v39 = vld [vmem:[#allocation2 + $0x110] sm:$0xff] }
  0x18   :  { %105 = vmatpush.msra.mxu1 %v93_v10  ;;  %v401_v33 = vld [vmem:[#allocation5] sm:$0xf]  ;;  %v123_v40 = vld [vmem:[#allocation2 + $0x108] sm:$0xff]  ;;  %v176_v42 = vld [vmem:[#allocation2 + $0x1f8] sm:$0xff] }
  0x19   :  { %141 = vmatpush.msra.mxu2 %v135_v23  ;;  %v56_v35 = vperm.slane %v401_v33, 0  ;;  %v122_v41 = vld [vmem:[#allocation2 + $0x100] sm:$0xff]  ;;  %v175_v43 = vld [vmem:[#allocation2 + $0x1f0] sm:$0xff]  ;;  %178 = vmatpush.msra.mxu3 %v176_v42  ;;  %v174_v44 = vld [vmem:[#allocation2 + $0x1e8] sm:$0xff]  ;;  %v99_v55 = vperm.slane %v401_v33, 1  ;;  %v138_v62 = vperm.slane %v401_v33, 2 }
  0x1a   :  { %106 = vmatpush.msra.mxu1 %v92_v11  ;;  %v173_v45 = vld [vmem:[#allocation2 + $0x1e0] sm:$0xff]  ;;  %v172_v46 = vld [vmem:[#allocation2 + $0x1d8] sm:$0xff]  ;;  %v171_v47 = vld [vmem:[#allocation2 + $0x1d0] sm:$0xff]  ;;  %v177_v3 = vperm.slane %v401_v33, 3  ;;  %v222_v11 = vlaneseq }
  0x1b   :  { %142 = vmatpush.msra.mxu2 %v134_v24  ;;  %179 = vmatpush.msra.mxu3 %v175_v43  ;;  %v170_v48 = vld [vmem:[#allocation2 + $0x1c8] sm:$0xff]  ;;  %v169_v49 = vld [vmem:[#allocation2 + $0x1c0] sm:$0xff]  ;;  %v168_v50 = vld [vmem:[#allocation2 + $0x1b8] sm:$0xff] }
  0x1c   :  { %107 = vmatpush.msra.mxu1 %v91_v12  ;;  %v167_v51 = vld [vmem:[#allocation2 + $0x1b0] sm:$0xff]  ;;  %v166_v52 = vld [vmem:[#allocation2 + $0x1a8] sm:$0xff]  ;;  %v165_v53 = vld [vmem:[#allocation2 + $0x1a0] sm:$0xff]  ;;  %v223_v12 = vand.u32 127, %v222_v11 }
  0x1d   :  { %143 = vmatpush.msra.mxu2 %v133_v25  ;;  %180 = vmatpush.msra.mxu3 %v174_v44  ;;  %v164_v54 = vld [vmem:[#allocation2 + $0x198] sm:$0xff]  ;;  %v163_v59 = vld [vmem:[#allocation2 + $0x190] sm:$0xff]  ;;  %v162_v60 = vld [vmem:[#allocation2 + $0x188] sm:$0xff] }
  0x1e   :  { %108 = vmatpush.msra.mxu1 %v90_v13  ;;  %v161_v61 = vld [vmem:[#allocation2 + $0x180] sm:$0xff] }
  0x1f   :  { %144 = vmatpush.msra.mxu2 %v132_v26  ;;  %181 = vmatpush.msra.mxu3 %v173_v45  ;;  %v221_v6 = vld [vmem:[%s417_s1] sm:$0xff] }
  0x20   :  { %109 = vmatpush.msra.mxu1 %v89_v14  ;;  %v360_v14 = vmov 0.0  }
  0x21   :  { %145 = vmatpush.msra.mxu2 %v131_v27  ;;  %182 = vmatpush.msra.mxu3 %v172_v46 }
  0x22   :  { %110 = vmatpush.msra.mxu1 %v88_v15 }
  0x23   :  { %146 = vmatpush.msra.mxu2 %v130_v28  ;;  %183 = vmatpush.msra.mxu3 %v171_v47 }
  0x24   :  { %111 = vmatpush.msra.mxu1 %v87_v16 }
  0x25   :  { %147 = vmatpush.msra.mxu2 %v129_v29  ;;  %184 = vmatpush.msra.mxu3 %v170_v48 }
  0x26   :  { %112 = vmatpush.msra.mxu1 %v86_v17 }
  0x27   :  { %148 = vmatpush.msra.mxu2 %v128_v30  ;;  %185 = vmatpush.msra.mxu3 %v169_v49 }
  0x28   :  { %113 = vmatpush.msra.mxu1 %v85_v18 }
  0x29   :  { %149 = vmatpush.msra.mxu2 %v127_v31  ;;  %186 = vmatpush.msra.mxu3 %v168_v50 }
  0x2a   :  { %114 = vmatpush.msra.mxu1 %v84_v19 }
  0x2b   :  { %150 = vmatpush.msra.mxu2 %v126_v32  ;;  %187 = vmatpush.msra.mxu3 %v167_v51 }
  0x2c   :  { %115 = vmatpush.msra.mxu1 %v83_v20 }
  0x2d   :  { %151 = vmatpush.msra.mxu2 %v125_v34  ;;  %188 = vmatpush.msra.mxu3 %v166_v52 }
  0x2f   :  { %152 = vmatpush.msra.mxu2 %v124_v39  ;;  %189 = vmatpush.msra.mxu3 %v165_v53 }
  0x31   :  { %153 = vmatpush.msra.mxu2 %v123_v40  ;;  %190 = vmatpush.msra.mxu3 %v164_v54 }
  0x33   :  { %154 = vmatpush.msra.mxu2 %v122_v41  ;;  %191 = vmatpush.msra.mxu3 %v163_v59 }
  0x35   :  { %192 = vmatpush.msra.mxu3 %v162_v60 }
  0x37   :  { %193 = vmatpush.msra.mxu3 %v161_v61 }
  0x91   :  { %v78_v36 = vpop.f32.mrf.mxu0 }
  0x92   :  { %v79_v37 = vadd.f32 %v78_v36, %v56_v35 }
  0x94   :  { %v81_v38 = vmax.f32 %v79_v37, 0.0 }
  0x96   :  { %116 = vmatmul.f32.vlgmr.msra.gmra.mxu1 %v81_v38 }
 0x113   :  { %v117_v56 = vpop.f32.mrf.mxu1 }
 0x114   :  { %v118_v57 = vadd.f32 %v117_v56, %v99_v55 }
 0x116   :  { %v120_v58 = vmax.f32 %v118_v57, 0.0 }
 0x118   :  { %155 = vmatmul.f32.vlgmr.msra.gmra.mxu2 %v120_v58 }
 0x19b   :  { %v156_v63 = vpop.f32.mrf.mxu2 }
 0x19c   :  { %v157_v0 = vadd.f32 %v156_v63, %v138_v62 }
 0x19e   :  { %v159_v1 = vmax.f32 %v157_v0, 0.0 }
 0x1a0   :  { %194 = vmatmul.f32.vlgmr.msra.gmra.mxu3 %v159_v1 }
 0x223   :  { %v195_v4 = vpop.f32.mrf.mxu3 }
 0x224   :  { %v196_v5 = vadd.f32 %v195_v4, %v177_v3 }
 0x226   :  { %198 = vmax.xlane.f32.xlu0 %v196_v5 }
 0x23a   :  { %225 = vperm.xlu0 %282, %v221_v6  }
 0x299   :  { %v199_v7 = vpop.xlane.xlu0 %198 }
 0x29a   :  { %v200_v8 = vsub.f32 %v196_v5, %v199_v7 }
 0x29c   :  { %v201_v9 = vmul.f32 1.442695, %v200_v8 }
 0x29e   :  { %283 = vpow2.f32 %v201_v9 }
 0x2a4   :  { %v284_v10 = vpop.eup %283 }
 0x2a5   :  { %203 = vadd.xlane.f32.xlu1 %v284_v10 }
 0x2ac   :  { %v226_v13 = vpop.permute.xlu0 %225 }
 0x2ad   :  { %vm227_vm1 = vcmp.eq.s32.totalorder %v223_v12, %v226_v13 }
 0x2ae   :  { %v272_v15 = vsel %vm227_vm1, 1.0, %v360_v14 }
 0x2af   :  { %v230_v16 = vmul.f32 %v272_v15, %v196_v5 }
 0x2b1   :  { %231 = vadd.xlane.f32.xlu1 %v230_v16 }
 0x318   :  { %v204_v17 = vpop.xlane.xlu1 %203 }
 0x319   :  { %285 = vrcp.f32 %v204_v17  ;;  %v216_v23 = vand.u32 2147483648, %v204_v17  ;;  %v214_v26 = vand.u32 2147483647, %v204_v17  ;;  %vm210_vm4 = vweird.f32 %v204_v17 }
 0x31a   :  { %287 = vlog2.f32 %v204_v17 }
 0x31b   :  { %v217_v30 = vor.u32 1.1754944e-38, %v216_v23  ;;  %vm215_vm6 = vcmp.eq.f32.partialorder %v214_v26, 8.507059e+37 }
 0x31f   :  { %v286_v18 = vpop.eup %285 }
 0x320   :  { %v288_v19 = vpop.eup %287  ;;  %v206_v20 = vmul.f32 %v286_v18, %v204_v17  ;;  %vm211_vm2 = vweird.f32 %v286_v18 }
 0x321   :  { %v234_v21 = vmul.f32 0.6931472, %v288_v19  ;;  %vm212_vm5 = vmor %vm210_vm4, %vm211_vm2 }
 0x322   :  { %v207_v22 = vsub.f32 1.0, %v206_v20 }
 0x323   :  { %v235_v24 = vadd.f32 %v234_v21, %v199_v7 }
 0x324   :  { %v208_v25 = vmul.f32 %v286_v18, %v207_v22  ;;  %v232_v27 = vpop.xlane.xlu1 %231 }
 0x325   :  { %v236_v28 = vsub.f32 %v235_v24, %v232_v27 }
 0x326   :  { %v209_v29 = vadd.f32 %v286_v18, %v208_v25 }
 0x327   :  { %v238_v31 = vsel %vm237_vm3, %v236_v28, 0.0 }
 0x328   :  { %v213_v32 = vsel %vm212_vm5, %v286_v18, %v209_v29  ;;  %239 = vadd.xlane.f32.xlu2 %v238_v31 }
 0x329   :  { %v218_v33 = vsel %vm215_vm6, %v217_v30, %v213_v32 }
 0x32a   :  { %v219_v34 = vmul.f32 %v284_v10, %v218_v33 }
 0x32c   :  { %220 = vst [vmem:[%s420_s4] sm:$0xff] %v219_v34 }
 0x39b   :  { %v240_v35 = vpop.xlane.xlu2 %239 }
 0x39c   :  { %v241_v36 = vrot.slane %v240_v35, 4 }
 0x39e   :  { %v242_v37 = vadd.f32 %v241_v36, %v240_v35 }
 0x3a0   :  { %v243_v38 = vrot.slane %v242_v37, 2 }
 0x3a2   :  { %v244_v39 = vadd.f32 %v243_v38, %v242_v37 }
 0x3a4   :  { %v245_v40 = vrot.slane %v244_v39, 1 }
 0x3a6   :  { %v246_v41 = vadd.f32 %v245_v40, %v244_v39 }
 0x3a8   :  { %273 = vpush %v246_v41 }
 0x3d9   :  { %s274_s10 = spop %273 }
 0x3da   :  { %249 = sst [smem:[#allocation7]] %s274_s10 }
 0x3db   :  { %260 = dma.smem_to_hbm %s361_s11, 16, %s258_s9, [#allocation4]  }
 0x3dc   :  { %353 = dma.done.wait [#allocation4], 16  }
 0x3dd   :  { %354 = vsyncadd [#allocation4], 4294967280 }
 0x3de   :  { %267 = sfence }
 0x3df   :  { %268 = vsyncpa [#allocation3], 1 }
 0x3e0   :  { %269 = vsyncpa [#allocation6], 1 }
 0x3e1   :  { %270 = vsyncpa [#allocation4], 1 }

</bundles_post_ra>
